<compile_context>
chip_gen: v7x
topology: tpu7x:2x2x1
jax: 0.10.0
libtpu: 0.0.40
codegen_flags: <defaults>
</compile_context>

<pallas_src>
import functools

import jax
import jax.numpy as jnp
from jax import lax
from jax.experimental import pallas as pl
from jax.experimental.pallas import tpu as pltpu

ALL_TEXT_LABELS = ['background', 'bag', 'belt', 'glasses', 'hair', 'socks',
                   'hat', 'mouth', 'clothes', 'eye', 'shoes', 'skin']
NUM_CLASSES = len(ALL_TEXT_LABELS)  # 12
LANE = 128                          # TPU lane width
TILE_N = 512                        # N-tile for large tag counts (multiple of 128)


def _round_up(x, m):
    return ((x + m - 1) // m) * m


def _tag_encoder_kernel(idx_ref, w_ref, o_ref):
    # idx_ref: (1, TN)            int32  tag-label indices (padded positions = 0)
    # w_ref  : (enc_dim, 13)      f32    [W | b]  (bias folded as last column)
    # o_ref  : (enc_dim, TN)      f32    batch dim squeezed out by BlockSpec
    tn = o_ref.shape[1]

    # Build [one_hot^T ; ones] : (13, TN) on the VPU.
    # Row r < 12  -> 1 where idx == r ; row 12 -> constant 1 (bias column).
    rows = lax.broadcasted_iota(jnp.int32, (NUM_CLASSES + 1, tn), 0)
    one_hot_t = ((rows == idx_ref[...]) | (rows == NUM_CLASSES)).astype(jnp.float32)

    # Single MXU matmul with fused bias: (enc_dim, 13) @ (13, TN) -> (enc_dim, TN)
    o_ref[...] = jnp.dot(w_ref[...], one_hot_t,
                         preferred_element_type=jnp.float32)


@functools.partial(jax.jit, static_argnames=("tile_n",))
def _tag_encoder_call(idx_pad, weight, bias, *, tile_n):
    enc_dim = weight.shape[0]
    n_pad = idx_pad.shape[1]
    # Fold bias into the weight matrix: (enc_dim, 13). Traced once per shape.
    w_aug = jnp.concatenate([weight, bias[:, None]], axis=1).astype(jnp.float32)

    grid = (n_pad // tile_n,)
    return pl.pallas_call(
        _tag_encoder_kernel,
        out_shape=jax.ShapeDtypeStruct((1, enc_dim, n_pad), jnp.float32),
        grid_spec=pltpu.PrefetchScalarGridSpec(
            num_scalar_prefetch=0,
            grid=grid,
            in_specs=[
                # idx tile moves along the grid; weights stay resident.
                pl.BlockSpec((1, tile_n), lambda i: (0, i)),
                pl.BlockSpec((enc_dim, NUM_CLASSES + 1), lambda i: (0, 0)),
            ],
            out_specs=pl.BlockSpec((pl.Squeezed(), enc_dim, tile_n),
                                   lambda i: (0, 0, i)),
        ),
        compiler_params=pltpu.CompilerParams(
            # N-tiles are independent -> parallel (sharded across v7x's 2 TCs).
            dimension_semantics=("parallel",)),
    )(idx_pad, w_aug)


def tag_feature_encoder_pallas(tags, weight, bias):
    """Pallas port of TagFeatureEncoder.forward.

    tags  : list of tag tuples/lists; tag[0] is a label string (host-side input)
    weight: (enc_dim, 12) float32  (torch nn.Linear weight layout)
    bias  : (enc_dim,)    float32
    returns (1, enc_dim, N) float32  == fc(one_hot).permute(0, 2, 1)
    """
    # TODO(synk): string-tag -> label-index lookup has no Pallas equivalent; host side.
    indices = [ALL_TEXT_LABELS.index(tag[0]) for tag in tags]
    n = len(indices)
    enc_dim = weight.shape[0]

    if n == 0:  # guard: zero-sized block shapes would fail at lowering
        return jnp.zeros((1, enc_dim, 0), jnp.float32)

    # Pad N to a lane-dense multiple of 128 (bucketed to TILE_N for large N)
    # so stores are unmasked and distinct small tag counts reuse one compile.
    n_pad = _round_up(n, LANE)
    tile_n = n_pad if n_pad <= TILE_N else TILE_N
    n_pad = _round_up(n_pad, tile_n)

    idx_pad = jnp.asarray(indices + [0] * (n_pad - n),
                          dtype=jnp.int32).reshape(1, n_pad)
    out_pad = _tag_encoder_call(idx_pad,
                                jnp.asarray(weight, jnp.float32),
                                jnp.asarray(bias, jnp.float32),
                                tile_n=tile_n)
    return out_pad[:, :, :n]


def tag_feature_encoder_reference(tags, weight, bias):
    """Pure-JAX reference of the PyTorch module."""
    indices = jnp.asarray([ALL_TEXT_LABELS.index(tag[0]) for tag in tags],
                          dtype=jnp.int32)
    one_hot = jax.nn.one_hot(indices, NUM_CLASSES, dtype=jnp.float32)[None]  # (1, N, 12)
    y = jnp.einsum('bnc,ec->bne', one_hot, weight) + bias[None, None, :]     # (1, N, E)
    return jnp.transpose(y, (0, 2, 1))                                       # (1, E, N)


if __name__ == "__main__":
    key = jax.random.PRNGKey(0)
    N_TAGS, ENC_DIM = 8, 32   # seq=8 tags, hidden=enc_dim=32

    k0, k1, k2 = jax.random.split(key, 3)
    # deterministic tag list (what the module's forward receives as `x`)
    tag_ids = jax.random.randint(k0, (N_TAGS,), 0, NUM_CLASSES)
    tags = [(ALL_TEXT_LABELS[int(i)],) for i in tag_ids]

    # synthetic nn.Linear(12, enc_dim) parameters
    weight = 0.1 * jax.random.normal(k1, (ENC_DIM, NUM_CLASSES), dtype=jnp.float32)
    bias = 0.05 * jax.random.normal(k2, (ENC_DIM,), dtype=jnp.float32)

    out = tag_feature_encoder_pallas(tags, weight, bias)
    out = jax.block_until_ready(out)

    ref = tag_feature_encoder_reference(tags, weight, bias)
    assert out.shape == (1, ENC_DIM, N_TAGS)
    assert jnp.allclose(out, ref, atol=1e-5, rtol=1e-5), (
        f"max abs diff {jnp.max(jnp.abs(out - ref))}")

    print("KERNEL_OK")
</pallas_src>

<mosaic_0001>
module attributes {stable_mosaic.version = 11 : i64} {
  func.func @_tag_encoder_kernel(%arg0: i32, %arg1: memref<1x128xi32, #tpu.memory_space<vmem>>, %arg2: memref<32x13xf32, #tpu.memory_space<vmem>>, %arg3: memref<1x32x128xf32, #tpu.memory_space<vmem>>) attributes {dimension_semantics = [#tpu.dimension_semantics<parallel>], iteration_bounds = array<i64: 1>, scalar_prefetch = 0 : i64, scratch_operands = 0 : i64, tpu.core_type = #tpu.core_type<tc>, window_params = [{transform_indices = @transform_0, window_bounds = array<i64: 1, 128>}, {pipeline_mode = #tpu.pipeline_mode<synchronous>, transform_indices = @transform_1, window_bounds = array<i64: 32, 13>}, {transform_indices = @transform_2, window_bounds = array<i64: 1, 32, 128>}]} {
    %0 = tpu.iota {dimensions = array<i32: 0>} : vector<13x128xi32>
    %c0 = arith.constant 0 : index
    %c0_0 = arith.constant 0 : index
    %1 = vector.load %arg1[%c0, %c0_0] : memref<1x128xi32, #tpu.memory_space<vmem>>, vector<1x128xi32>
    %2 = vector.broadcast %1 : vector<1x128xi32> to vector<13x128xi32>
    %3 = arith.cmpi eq, %0, %2 : vector<13x128xi32>
    %c12_i32 = arith.constant 12 : i32
    %4 = vector.broadcast %c12_i32 : i32 to vector<13x128xi32>
    %5 = arith.cmpi eq, %0, %4 : vector<13x128xi32>
    %6 = arith.ori %3, %5 : vector<13x128xi1>
    %7 = arith.extui %6 : vector<13x128xi1> to vector<13x128xi32>
    %8 = arith.sitofp %7 : vector<13x128xi32> to vector<13x128xf32>
    %c0_1 = arith.constant 0 : index
    %c0_2 = arith.constant 0 : index
    %9 = vector.load %arg2[%c0_1, %c0_2] : memref<32x13xf32, #tpu.memory_space<vmem>>, vector<32x13xf32>
    %cst = arith.constant dense<0.000000e+00> : vector<32x128xf32>
    %10 = tpu.matmul %9, %8, %cst {dimension_numbers = #tpu.dot_dimension_numbers<[1], [0], [0], [1], [0, 0, 1, 1], [], []>} : vector<32x13xf32>, vector<13x128xf32>, vector<32x128xf32> -> vector<32x128xf32>
    %c0_3 = arith.constant 0 : index
    %c0_4 = arith.constant 0 : index
    %c0_5 = arith.constant 0 : index
    %11 = vector.load %arg3[%c0_3, %c0_4, %c0_5] : memref<1x32x128xf32, #tpu.memory_space<vmem>>, vector<1x32x128xf32>
    %12 = vector.shape_cast %11 : vector<1x32x128xf32> to vector<32x128xf32>
    %13 = vector.shape_cast %10 : vector<32x128xf32> to vector<1x32x128xf32>
    tpu.vector_store %arg3[%c0_3, %c0_4, %c0_5], %13 {strides = array<i32>} : memref<1x32x128xf32, #tpu.memory_space<vmem>>, vector<1x32x128xf32>,
    return
  }
  func.func @transform_0(%arg0: i32) -> (i32, i32) {
    %c0_i32 = arith.constant 0 : i32
    %c0_i32_0 = arith.constant 0 : i32
    return %c0_i32, %arg0 : i32, i32
  }
  func.func @transform_1(%arg0: i32) -> (i32, i32) {
    %c0_i32 = arith.constant 0 : i32
    %c0_i32_0 = arith.constant 0 : i32
    %c0_i32_1 = arith.constant 0 : i32
    return %c0_i32, %c0_i32_0 : i32, i32
  }
  func.func @transform_2(%arg0: i32) -> (i32, i32, i32) {
    %c0_i32 = arith.constant 0 : i32
    %c0_i32_0 = arith.constant 0 : i32
    %c0_i32_1 = arith.constant 0 : i32
    return %c0_i32, %c0_i32_0, %arg0 : i32, i32, i32
  }
}

</mosaic_0001>

<bundles_post_ra>
// kernel: _tag_encoder_call.1
= control target key start
LH: loop header
LB: loop body
LE: loop exit
PB: predicated region body
PF: predicated region fallthrough
CT: control target
= control target key end

     0   :  { %v12_v0 = vlaneseq  ;;  %vm34_vm0 = vcmask 105472   ;;  %s269_s0 = inlined_call_operand.vmem [shape: s32[1,128], index: 0, kind: input, shape index: {}]   ;;  %s270_s1 = inlined_call_operand.vmem [shape: f32[32,13], index: 1, kind: input, shape index: {}]   ;;  %s271_s2 = inlined_call_operand.hbm [shape: f32[1,32,128], index: 2, kind: output, shape index: {}]  }
   0x1   :  { %v30_v1 = vld [vmem:[%s270_s1] sm:$0xff]  ;;  %v32_v2 = vld [vmem:[%s270_s1 + $0x10] sm:$0xff] }
   0x2   :  { %v13_v3 = vshrl.u32 %v12_v0, 7  ;;  %175 = vmatprep.mubr.msk.f32.mxu0 %vm34_vm0, %v30_v1  ;;  %178 = vmatprep.mubr.msk.f32.mxu1 %vm34_vm0, %v32_v2 }
   0x3   :  { %7 = vsyncpa [#allocation3], 0  ;;  %v156_v4 = vld [vmem:[%s269_s0] ss:$0 sm:$0xff]  ;;  %vm47_vm2 = vcmask 1044480   ;;  %v218_v6 = vmov 0.0  }
   0x4   :  { %v14_v5 = vadd.s32 8, %v13_v3  ;;  %vm20_vm1 = vcmp.eq.s32.totalorder %v13_v3, %v156_v4  ;;  %v219_v8 = vmov 1.0   ;;  %v31_v10 = vld [vmem:[%s270_s1 + $0x8] sm:$0xff]  ;;  %v33_v11 = vld [vmem:[%s270_s1 + $0x18] sm:$0xff]  ;;  %s220_s18 = smov [#allocation2]  }
   0x5   :  { %vm182_vm6 = vmpackc.low %vm47_vm2, %vm20_vm1  ;;  %s145_s19 = sshll.u32 %s220_s18, 4  ;;  %s146_s19 = int_to_ptr.vmem [resolvable:$true] %s145_s19 }
   0x6   :  { %vm21_vm3 = vcmp.eq.s32.totalorder %v14_v5, %v156_v4  ;;  %vm23_vm4 = vcmp.eq.s32.totalorder %v14_v5, 12  ;;  %s194_s20 = scalar_lea.vmem %s146_s19, 512  ;;  %p199_p1 = scmp.lt.s32.totalorder %s146_s19, %s146_s19 }
   0x7   :  { %vm25_vm5 = vmor %vm21_vm3, %vm23_vm4  ;;  %p195_p0 = scmp.ne.s32.totalorder %s146_s19, %s194_s20  ;;  %p200_p2 = scmp.lt.s32.totalorder %s194_s20, %s194_s20 }
   0x8   :  { %v158_v7 = vsel %vm25_vm5, 1.0, %v218_v6 }
   0x9   :  { %v181_v9 = vpack.c.bf16 %v158_v7, %v219_v8  ;;  %p201_p3 = por %p200_p2, %p199_p1 }
   0xb   :  { %183 = vmatprep.subr.msk.bf16.mxu0 %vm182_vm6, %v181_v9  ;;  %187 = vmatprep.subr.msk.bf16.mxu1 %vm182_vm6, %v181_v9  ;;  %p202_p4 = pnand %p201_p3, %p195_p0 }
   0xc   :  { %186 = vmatpush3.bf16.msk.msra.mxu0 %vm182_vm6, %v181_v9  ;;  %188 = vmatpush3.bf16.msk.msra.mxu1 %vm182_vm6, %v181_v9 }
   0xf   :  { %176 = vmatmul.mubr.msk.f32.vlgmr.msra.gmra.mrb[0].mxu0 %vm34_vm0, %v31_v10  ;;  %179 = vmatmul.mubr.msk.f32.vlgmr.msra.gmra.mrb[0].mxu1 %vm34_vm0, %v33_v11 }
  0xe2   :  { %v177_v12 = vpop.f32.mrb[0].mxu0  ;;  %v180_v13 = vpop.f32.mrb[0].mxu1 }
  0xe3   :  { %137 = vst [vmem:[#allocation2 + $0x8] sm:$0xff] %v177_v12  ;;  %139 = vst [vmem:[#allocation2 + $0x18] sm:$0xff] %v180_v13  ;;  %v117_v14 = vpop.f32.mrb[1].mxu0  ;;  %v127_v15 = vpop.f32.mrb[1].mxu1 }
  0xe4   :  { %136 = vst [vmem:[#allocation2] sm:$0xff] %v117_v14  ;;  %138 = vst [vmem:[#allocation2 + $0x10] sm:$0xff] %v127_v15 }
  0xe5   :  { %205 = shalt.err (!%p202_p4)
}
  0xe6   :  { %s206_s22 = scalar_lea.hbm %s271_s2, 512 }
  0xe7   :  { %p207_p5 = scmp.ne.s32.totalorder %s271_s2, %s206_s22  ;;  %p210_p6 = scmp.lt.u32.totalorder %s206_s22, %s271_s2 }
  0xe9   :  { %p212_p7 = pnand %p210_p6, %p207_p5 }
  0xeb   :  { %215 = shalt.err (!%p212_p7)
}
  0xec   :  { %s221_s27 = smov 128   ;;  %s222_s28 = smov 8  }
  0xed   :  { %151 = dma.vmem_to_hbm [thread:$0]  %s146_s19, 512, %s271_s2, [#allocation3], %s221_s27, %s221_s27, %s222_s28  }
  0xee   :  { %216 = dma.done.wait [#allocation3], 512  }
  0xef   :  { %217 = vsyncadd [#allocation3], 4294966784 }
  0xf0   :  { %155 = vsyncpa [#allocation3], 1 }

</bundles_post_ra>
